<compile_context>
chip_gen: v5e
topology: v5e:2x2
jax: 0.10.0
libtpu: 0.0.40
codegen_flags: <defaults>
</compile_context>

<pallas_src>
import functools
import math

import jax
import jax.numpy as jnp
from jax.experimental import pallas as pl
from jax.experimental.pallas import tpu as pltpu


# ----------------------------------------------------------------------------
# Kernel 1: split linear   out[s] = x @ w[s] + b[s]
# ----------------------------------------------------------------------------
def _linear_kernel(x_ref, w_ref, b_ref, o_ref):
    # Native-dtype operands, f32 accumulation on the MXU.
    acc = jnp.dot(x_ref[...], w_ref[0], preferred_element_type=jnp.float32)
    acc = acc + b_ref[0].astype(jnp.float32)
    o_ref[0] = acc.astype(o_ref.dtype)


def linear_split(x, w, b, *, tm=256):
    """x: (M, K); w: (S, K, Cs); b: (S, 1, Cs) -> (S, M, Cs).

    S=1 is a plain linear; S=3 writes q/k/v as separate leading slices so the
    head split downstream needs no data movement.
    """
    M, K = x.shape
    S, Kw, Cs = w.shape
    assert K == Kw and b.shape == (S, 1, Cs)

    tm = min(tm, M)
    Mp = pl.cdiv(M, tm) * tm                  # pad rows instead of asserting
    xp = jnp.pad(x, ((0, Mp - M), (0, 0))) if Mp != M else x

    out = pl.pallas_call(
        _linear_kernel,
        out_shape=jax.ShapeDtypeStruct((S, Mp, Cs), x.dtype),
        grid_spec=pltpu.PrefetchScalarGridSpec(
            num_scalar_prefetch=0,
            grid=(S, Mp // tm),               # rows innermost -> w/b resident per split
            in_specs=[
                pl.BlockSpec((tm, K), lambda s, i: (i, 0)),        # x row tile
                pl.BlockSpec((1, K, Cs), lambda s, i: (s, 0, 0)),  # w[s] (resident)
                pl.BlockSpec((1, 1, Cs), lambda s, i: (s, 0, 0)),  # b[s] (resident)
            ],
            out_specs=pl.BlockSpec((1, tm, Cs), lambda s, i: (s, i, 0)),
        ),
        compiler_params=pltpu.CompilerParams(
            dimension_semantics=("parallel", "parallel")),
    )(xp, w, b)
    return out if Mp == M else out[:, :M, :]


# ----------------------------------------------------------------------------
# Kernel 2: attention core — G heads per grid step, tiled query dimension
# ----------------------------------------------------------------------------
def _attn_core_kernel(q_ref, k_ref, v_ref, *out_refs,
                      scale, heads_per_blk, head_dim, store_attn):
    G, hd = heads_per_blk, head_dim
    if store_attn:
        attn_ref, ctx_ref = out_refs
    else:
        (ctx_ref,) = out_refs

    # Fold the softmax scale into q: tq*G*hd multiplies instead of G*tq*N.
    q = q_ref[0, 0] * scale                  # (tq, G*hd)
    k = k_ref[0, 0]                          # (N,  G*hd)
    v = v_ref[0, 0]                          # (N,  G*hd)

    ctx_parts = []
    for g in range(G):                       # static unroll over the head group
        sl = slice(g * hd, (g + 1) * hd)
        q_h, k_h, v_h = q[:, sl], k[:, sl], v[:, sl]

        # scores = (q*scale) @ k^T — contraction on head_dim handled by the MXU.
        s = jax.lax.dot_general(q_h, k_h, (((1,), (1,)), ((), ())),
                                preferred_element_type=jnp.float32)   # (tq, N)

        # numerically-stable softmax in f32
        s = s - jnp.max(s, axis=-1, keepdims=True)
        e = jnp.exp(s)
        # one reciprocal per row + multiply instead of tq*N divides
        # (approx=True would move it onto the EUP at slightly relaxed numerics)
        inv = pl.reciprocal(jnp.sum(e, axis=-1, keepdims=True), approx=False)
        a = e * inv

        if store_attn:
            attn_ref[0, g] = a.astype(attn_ref.dtype)
        # attn_drop: eval-mode identity
        ctx_parts.append(
            jnp.dot(a.astype(v_h.dtype), v_h, preferred_element_type=jnp.float32))

    # Merged-head ctx written straight into (B, N, C) layout with one
    # lane-dense store (block minor dim = G*hd).
    ctx = ctx_parts[0] if G == 1 else jnp.concatenate(ctx_parts, axis=-1)
    ctx_ref[0] = ctx.astype(ctx_ref.dtype)


def _pick_head_group(heads, head_dim):
    """Heads per grid step: smallest divisor of `heads` with G*head_dim a
    multiple of 128 (lane-dense ctx blocks); otherwise all heads at once."""
    for g in range(1, heads):
        if heads % g == 0 and (g * head_dim) % 128 == 0:
            return g
    return heads


def attention_core(qkv, *, heads, scale, tq=256, group=None, return_attn=True):
    """qkv: (3, B, N, C) -> (attn: (B, heads, N, N), ctx: (B, N, C)).

    If return_attn=False only ctx is produced (skips the dominant N^2 HBM
    writeback when the attention map is not needed).
    """
    _, B, N, C = qkv.shape
    hd = C // heads
    G = group if group is not None else _pick_head_group(heads, hd)
    assert heads % G == 0 and (G == heads or (G * hd) % 128 == 0)
    ng = heads // G
    tq = tq if (tq < N and N % tq == 0) else N   # query tiling bounds VMEM to O(tq*N)
    nq = N // tq

    kernel = functools.partial(
        _attn_core_kernel, scale=scale, heads_per_blk=G, head_dim=hd,
        store_attn=return_attn)

    # q/k/v are head-group column slices of the same (3, B, N, C) tensor — the
    # head split lives entirely in the index maps (no wrapper permute/copy).
    # K/V index maps ignore qi -> stay VMEM-resident across the query loop.
    q_spec = pl.BlockSpec((1, 1, tq, G * hd), lambda b, g, qi: (0, b, qi, g))
    k_spec = pl.BlockSpec((1, 1, N, G * hd), lambda b, g, qi: (1, b, 0, g))
    v_spec = pl.BlockSpec((1, 1, N, G * hd), lambda b, g, qi: (2, b, 0, g))
    ctx_spec = pl.BlockSpec((1, tq, G * hd), lambda b, g, qi: (b, qi, g))
    ctx_shape = jax.ShapeDtypeStruct((B, N, C), qkv.dtype)

    if return_attn:
        out_specs = (pl.BlockSpec((1, G, tq, N), lambda b, g, qi: (b, g, qi, 0)),
                     ctx_spec)
        out_shape = (jax.ShapeDtypeStruct((B, heads, N, N), qkv.dtype), ctx_shape)
    else:
        out_specs = ctx_spec
        out_shape = ctx_shape

    return pl.pallas_call(
        kernel,
        out_shape=out_shape,
        grid_spec=pltpu.PrefetchScalarGridSpec(
            num_scalar_prefetch=0,
            grid=(B, ng, nq),                 # qi innermost -> K/V residency
            in_specs=[q_spec, k_spec, v_spec],
            out_specs=out_specs,
        ),
        compiler_params=pltpu.CompilerParams(
            dimension_semantics=("parallel", "parallel", "parallel")),
    )(qkv, qkv, qkv)


# ----------------------------------------------------------------------------
# Full forward (mirrors Attention.forward; dropout = eval identity)
# ----------------------------------------------------------------------------
def attention_forward(x, w_qkv, b_qkv, w_proj, b_proj, *, heads, tm=256, tq=256):
    B, N, C = x.shape
    hd = C // heads
    scale = hd ** (-0.5)

    # Weight prep (one-time in a real model): split the qkv weight so the
    # projection writes q/k/v as separate leading slices -> no qkv permute.
    w3 = w_qkv.reshape(C, 3, C).transpose(1, 0, 2)     # (3, C, C)
    b3 = b_qkv.reshape(3, 1, C)

    qkv = linear_split(x.reshape(B * N, C), w3, b3, tm=tm)   # (3, B*N, C)
    qkv = qkv.reshape(3, B, N, C)                            # free reshape, no transpose

    attn, ctx = attention_core(qkv, heads=heads, scale=scale, tq=tq,
                               return_attn=True)             # (B,H,N,N), (B,N,C)

    out = linear_split(ctx.reshape(B * N, C),
                       w_proj.reshape(1, C, C), b_proj.reshape(1, 1, C),
                       tm=tm)                                # (1, B*N, C)
    # proj_drop: eval-mode identity
    return out.reshape(B, N, C), attn


# ----------------------------------------------------------------------------
# Pure-JAX reference
# ----------------------------------------------------------------------------
def attention_ref(x, w_qkv, b_qkv, w_proj, b_proj, *, heads):
    B, N, C = x.shape
    hd = C // heads
    scale = hd ** (-0.5)
    qkv = x @ w_qkv + b_qkv
    qkv = qkv.reshape(B, N, 3, heads, hd).transpose(2, 0, 3, 1, 4)
    q, k, v = qkv[0], qkv[1], qkv[2]
    s = jnp.einsum('bhnd,bhmd->bhnm', q, k) * scale
    attn = jax.nn.softmax(s, axis=-1)
    ctx = jnp.einsum('bhnm,bhmd->bhnd', attn, v)
    out = ctx.transpose(0, 2, 1, 3).reshape(B, N, C) @ w_proj + b_proj
    return out, attn


if __name__ == "__main__":
    # Small ViT-like shapes: batch=2, seq=8, dim=32, heads=4 (head_dim=8)
    B, N, dim, heads = 2, 8, 32, 4

    key = jax.random.PRNGKey(0)
    kx, kwq, kbq, kwp, kbp = jax.random.split(key, 5)

    x = jax.random.normal(kx, (B, N, dim), dtype=jnp.float32)

    # PyTorch-style init U(-1/sqrt(fan_in), 1/sqrt(fan_in)); weights stored
    # as (in, out) = nn.Linear.weight.T
    lim = 1.0 / math.sqrt(dim)
    w_qkv = jax.random.uniform(kwq, (dim, 3 * dim), jnp.float32, -lim, lim)
    b_qkv = jax.random.uniform(kbq, (3 * dim,), jnp.float32, -lim, lim)
    w_proj = jax.random.uniform(kwp, (dim, dim), jnp.float32, -lim, lim)
    b_proj = jax.random.uniform(kbp, (dim,), jnp.float32, -lim, lim)

    out, attn = attention_forward(x, w_qkv, b_qkv, w_proj, b_proj, heads=heads)
    jax.block_until_ready((out, attn))

    out_r, attn_r = attention_ref(x, w_qkv, b_qkv, w_proj, b_proj, heads=heads)
    assert out.shape == (B, N, dim) and attn.shape == (B, heads, N, N)
    assert jnp.allclose(out, out_r, atol=1e-4, rtol=1e-4), "output mismatch"
    assert jnp.allclose(attn, attn_r, atol=1e-4, rtol=1e-4), "attn mismatch"

    print("KERNEL_OK")
</pallas_src>

<mosaic_0001>
module attributes {stable_mosaic.version = 11 : i64} {
  func.func @_linear_kernel(%arg0: i32, %arg1: i32, %arg2: memref<16x32xf32, #tpu.memory_space<vmem>>, %arg3: memref<1x32x32xf32, #tpu.memory_space<vmem>>, %arg4: memref<1x1x32xf32, #tpu.memory_space<vmem>>, %arg5: memref<1x16x32xf32, #tpu.memory_space<vmem>>) attributes {dimension_semantics = [#tpu.dimension_semantics<parallel>, #tpu.dimension_semantics<parallel>], iteration_bounds = array<i64: 3, 1>, scalar_prefetch = 0 : i64, scratch_operands = 0 : i64, tpu.core_type = #tpu.core_type<tc>, window_params = [{transform_indices = @transform_0, window_bounds = array<i64: 16, 32>}, {transform_indices = @transform_1, window_bounds = array<i64: 1, 32, 32>}, {transform_indices = @transform_2, window_bounds = array<i64: 1, 1, 32>}, {transform_indices = @transform_3, window_bounds = array<i64: 1, 16, 32>}]} {
    %c0 = arith.constant 0 : index
    %c0_0 = arith.constant 0 : index
    %0 = vector.load %arg2[%c0, %c0_0] : memref<16x32xf32, #tpu.memory_space<vmem>>, vector<16x32xf32>
    %c0_1 = arith.constant 0 : index
    %c0_2 = arith.constant 0 : index
    %c0_3 = arith.constant 0 : index
    %1 = vector.load %arg3[%c0_1, %c0_2, %c0_3] : memref<1x32x32xf32, #tpu.memory_space<vmem>>, vector<1x32x32xf32>
    %2 = vector.shape_cast %1 : vector<1x32x32xf32> to vector<32x32xf32>
    %cst = arith.constant dense<0.000000e+00> : vector<16x32xf32>
    %3 = tpu.matmul %0, %2, %cst {dimension_numbers = #tpu.dot_dimension_numbers<[1], [0], [0], [1], [0, 0, 1, 1], [], []>} : vector<16x32xf32>, vector<32x32xf32>, vector<16x32xf32> -> vector<16x32xf32>
    %c0_4 = arith.constant 0 : index
    %c0_5 = arith.constant 0 : index
    %c0_6 = arith.constant 0 : index
    %4 = vector.load %arg4[%c0_4, %c0_5, %c0_6] : memref<1x1x32xf32, #tpu.memory_space<vmem>>, vector<1x1x32xf32>
    %5 = vector.shape_cast %4 : vector<1x1x32xf32> to vector<1x32xf32>
    %6 = vector.broadcast %5 : vector<1x32xf32> to vector<16x32xf32>
    %7 = arith.addf %3, %6 : vector<16x32xf32>
    %c0_7 = arith.constant 0 : index
    %c0_8 = arith.constant 0 : index
    %c0_9 = arith.constant 0 : index
    %8 = vector.load %arg5[%c0_7, %c0_8, %c0_9] : memref<1x16x32xf32, #tpu.memory_space<vmem>>, vector<1x16x32xf32>
    %9 = vector.shape_cast %8 : vector<1x16x32xf32> to vector<16x32xf32>
    %10 = vector.shape_cast %7 : vector<16x32xf32> to vector<1x16x32xf32>
    tpu.vector_store %arg5[%c0_7, %c0_8, %c0_9], %10 {strides = array<i32>} : memref<1x16x32xf32, #tpu.memory_space<vmem>>, vector<1x16x32xf32>,
    return
  }
  func.func @transform_0(%arg0: i32, %arg1: i32) -> (i32, i32) {
    %c0_i32 = arith.constant 0 : i32
    %c0_i32_0 = arith.constant 0 : i32
    return %arg1, %c0_i32 : i32, i32
  }
  func.func @transform_1(%arg0: i32, %arg1: i32) -> (i32, i32, i32) {
    %c0_i32 = arith.constant 0 : i32
    %c0_i32_0 = arith.constant 0 : i32
    %c0_i32_1 = arith.constant 0 : i32
    return %arg0, %c0_i32, %c0_i32_0 : i32, i32, i32
  }
  func.func @transform_2(%arg0: i32, %arg1: i32) -> (i32, i32, i32) {
    %c0_i32 = arith.constant 0 : i32
    %c0_i32_0 = arith.constant 0 : i32
    %c0_i32_1 = arith.constant 0 : i32
    return %arg0, %c0_i32, %c0_i32_0 : i32, i32, i32
  }
  func.func @transform_3(%arg0: i32, %arg1: i32) -> (i32, i32, i32) {
    %c0_i32 = arith.constant 0 : i32
    %c0_i32_0 = arith.constant 0 : i32
    return %arg0, %arg1, %c0_i32 : i32, i32, i32
  }
}

</mosaic_0001>

<bundles_post_ra>
// kernel: tpu_custom_call.1
= control target key start
LH: loop header
LB: loop body
LE: loop exit
PB: predicated region body
PF: predicated region fallthrough
CT: control target
= control target key end

     0   :  { %8 = vsyncpa [#allocation3], 0  ;;  %s929_s0 = inlined_call_operand.hbm [shape: f32[16,32], index: 0, kind: input, shape index: {}]   ;;  %s930_s1 = inlined_call_operand.hbm [shape: f32[3,32,32], index: 1, kind: input, shape index: {}]   ;;  %s931_s2 = inlined_call_operand.hbm [shape: f32[3,1,32], index: 2, kind: input, shape index: {}]   ;;  %s932_s3 = inlined_call_operand.hbm [shape: f32[3,16,32], index: 3, kind: output, shape index: {}]  }
   0x1   :  { %9 = vsyncpa [#allocation6], 0 }
   0x2   :  { %11 = vsyncpa [#allocation6 + $0x1], 0 }
   0x3   :  { %12 = vsyncpa [#allocation4], 0 }
   0x4   :  { %14 = vsyncpa [#allocation4 + $0x1], 0  ;;  %s749_s12 = smov 0   ;;  %s751_s13 = smov 0  }
   0x5   :  { %s753_s14 = smov 0   ;;  %s755_s15 = smov 0  }
   0x6   :  { %s757_s16 = smov 0   ;;  %s759_s17 = smov 0  }
   0x7 LB: > { %s32_s18 = sadd.s32 1, %s718_s16  ;;  %s65_s19 = sadd.s32 1, %s710_s14  ;;  %s722_s17 = sphi %s759_s17, %s20_s17   ;;  %s718_s16 = sphi %s757_s16, %s943_s16   ;;  %s714_s15 = sphi %s755_s15, %s942_s15   ;;  %s710_s14 = sphi %s753_s14, %s941_s14   ;;  %s706_s13 = sphi %s751_s13, %s940_s13   ;;  %s702_s12 = sphi %s749_s12, %s939_s12  }
   0x8   : > { %p34_p0 = scmp.ge.s32.totalorder %s32_s18, 3  ;;  %p72_p1 = scmp.ne.s32.totalorder %s710_s14, %s706_s13 }
   0x9   : > { %p73_p2 = scmp.eq.s32.totalorder %s722_s17, 0  ;;  %p489_p5 = scmp.lt.s32.totalorder %s722_s17, 3 }
   0xa   : > { %s945_s18 = smov (%p34_p0, %s32_s18), 0  ;;  %s173_s22 = sand.u32 1, %s722_s17  }
   0xb   : > { %p789_p3 = por %p73_p2, %p72_p1  ;;  %s62_s21 = ssub.s32 %s718_s16, %s945_s18 }
   0xc   : > { %p63_p4 = scmp.eq.s32.totalorder %s62_s21, 0  ;;  %s175_s23 = sand.u32 1, %s710_s14  }
   0xd   : > { %s443_s25 = sshll.u32 %s175_s23, 5  ;;  %s457_s26 = sshll.u32 %s718_s16, 5 }
   0xe   : > { %s799_s24 = scalar_select %p63_p4, %s710_s14, %s65_s19  }
   0xf   : > { %s182_s29 = scalar_lea.hbm %s930_s1, %s457_s26  ;;  %s177_s30 = scalar_lea.vmem [#allocation5], %s443_s25 }
  0x10   : > { %s185_s4 = sshll.u32 %s177_s30, 4  ;;  %s183_s5 = sshll.u32 %s182_s29, 4  ;;  %s186_s4 = int_to_ptr.vmem [resolvable:$true] %s185_s4  ;;  %s184_s5 = int_to_ptr.hbm [resolvable:$true] %s183_s5 }
  0x11   : > { %p809_p6 = pnand %p489_p5, %p789_p3  ;;  %s813_s7 = scalar_lea.sflag [#allocation6], %s173_s22 }
  0x12   : > { %s724_s8 = smov 128   ;;  %s725_s9 = smov 8  }
  0x13   : > { %480 = dma.hbm_to_vmem [thread:$0]  (!%p809_p6), %s184_s5, 512, %s186_s4, %s813_s7, %s724_s8, %s724_s8, %s725_s9  }
  0x14   : > { %s822_s10 = sadd.s32 4294967295, %s722_s17   ;;  %s439_s11 = sadd.s32 4294967294, %s722_s17  }
  0x15   : > { %p78_p7 = scmp.ne.s32.totalorder %s706_s13, %s702_s12  ;;  %p79_p8 = scmp.eq.s32.totalorder %s822_s10, 0 }
  0x16   : > { %p130_p9 = scmp.eq.s32.totalorder %s822_s10, 2  ;;  %p136_p10 = scmp.eq.s32.totalorder %s439_s11, 2 }
  0x17   : > { %p440_p11 = scmp.ge.s32.totalorder %s722_s17, 1  ;;  %p832_p12 = por %p79_p8, %p78_p7 }
  0x18   : > { %p839_p13 = por %p130_p9, %p72_p1  ;;  %p843_p0 = por %p136_p10, %p78_p7 }
  0x19   : > { %p143_p2 = scmp.lt.s32.totalorder %s722_s17, 4  ;;  %s157_s26 = sshll.u32 %s929_s0, 4  ;;  %s158_s26 = int_to_ptr.hbm [resolvable:$true] %s157_s26 }
  0x1a   : > { %s726_s28 = smov [#allocation2]   ;;  %s201_s5 = scalar_lea.hbm %s931_s2, %s718_s16 }
  0x1b   : > { %p851_p3 = pnand %p440_p11, %p143_p2  ;;  %s159_s29 = sshll.u32 %s726_s28, 4  ;;  %s160_s29 = int_to_ptr.vmem [resolvable:$true] %s159_s29 }
  0x1c   : > { %s203_s11 = sshll.u32 %s201_s5, 4  ;;  %s198_s22 = scalar_lea.vmem [#allocation7], %s175_s23  ;;  %s204_s11 = int_to_ptr.hbm [resolvable:$true] %s203_s11 }
  0x1d   : > { %p473_p1 = pneg %p851_p3  ;;  %s205_s25 = sshll.u32 %s198_s22, 4  ;;  %s206_s25 = int_to_ptr.vmem [resolvable:$true] %s205_s25 }
  0x1e   : > { %483 = dma.hbm_to_vmem [thread:$0]  (!%p809_p6), %s204_s11, 16, %s206_s25, %s813_s7  }
  0x1f   : > { %p474_p4 = pnand %p473_p1, %p79_p8  ;;  %214 = sbr.rel (%p851_p3) target bundleno = 182 (0xb6), region = 32 }
  0x21   : > { %476 = dma.hbm_to_vmem [thread:$0]  (!%p474_p4), %s158_s26, 256, %s160_s29, [#allocation3], %s724_s8, %s724_s8, %s725_s9  }
  0x24   : > { %689 = dma.done.wait (%p79_p8), [#allocation3], 256  }
  0x25   : > { %691 = vsyncadd (%p79_p8), [#allocation3], 4294967040  ;;  %s221_s23 = sand.u32 1, %s822_s10   ;;  %s879_s28 = sand.u32 1, %s706_s13  }
  0x26   : > { %s448_s30 = sshll.u32 %s879_s28, 5  ;;  %s222_s8 = scalar_lea.sflag [#allocation6], %s221_s23 }
  0x27   : > { %s225_s6 = scalar_lea.vmem [#allocation5], %s448_s30 }
  0x28   : > { %693 = dma.done.wait (%p832_p12), %s222_s8, 528  }
  0x29   : > { %695 = vsyncadd (%p832_p12), %s222_s8, 4294966768  ;;  %v269_v0 = vld [vmem:[%s225_s6 + $0x18] sm:$0xff]  ;;  %v268_v1 = vld [vmem:[%s225_s6 + $0x10] sm:$0xff]  ;;  %s234_s7 = scalar_lea.vmem [#allocation7], %s879_s28  ;;  %vm274_vm0 = vcmask 261120   ;;  %s449_s9 = sshll.u32 %s879_s28, 4 }
  0x2a   : > { %293 = vmatpush.msra.mxu0 %v269_v0  ;;  %459 = vmatpush.msra.mxu1 %v269_v0  ;;  %v267_v2 = vld [vmem:[%s225_s6 + $0x8] sm:$0xff]  ;;  %v266_v3 = vld [vmem:[%s225_s6] sm:$0xff]  ;;  %v264_v4 = vld [vmem:[#allocation2] sm:$0xff]  ;;  %s458_s10 = sshll.u32 %s714_s15, 4  ;;  %s261_s29 = scalar_lea.vmem [#allocation8], %s449_s9 }
  0x2b   : > { %v265_v5 = vld [vmem:[#allocation2 + $0x8] sm:$0xff]  ;;  %s320_s27 = scalar_lea.hbm %s932_s3, %s458_s10  ;;  %v545_v6 = vld [vmem:[%s234_s7] ss:$0 sm:$0xff]  ;;  %s321_s4 = sshll.u32 %s261_s29, 4  ;;  %s322_s4 = int_to_ptr.vmem [resolvable:$true] %s321_s4 }
  0x2c   : > { %294 = vmatpush.msra.mxu0 %v268_v1  ;;  %460 = vmatpush.msra.mxu1 %v268_v1  ;;  %s323_s5 = sshll.u32 %s320_s27, 4  ;;  %s307_s15 = scalar_lea.sflag [#allocation4], %s879_s28  ;;  %s324_s5 = int_to_ptr.hbm [resolvable:$true] %s323_s5 }
  0x2d   : > { %s650_s11 = sshra.s32 %s324_s5, 4  ;;  %s656_s30 = scalar_lea.hbm %s932_s3, 48  ;;  %s651_s11 = int_to_ptr.hbm [resolvable:$true] %s650_s11 }
  0x2e   : > { %295 = vmatpush.msra.mxu0 %v267_v2  ;;  %461 = vmatpush.msra.mxu1 %v267_v2  ;;  %s652_s22 = scalar_lea.hbm %s651_s11, 16  ;;  %p657_p8 = scmp.lt.s32.totalorder %s651_s11, %s932_s3 }
  0x2f   : > { %p653_p5 = scmp.ne.s32.totalorder %s651_s11, %s652_s22  ;;  %p658_p9 = scmp.lt.s32.totalorder %s656_s30, %s652_s22 }
  0x30   : > { %296 = vmatpush.msra.mxu0 %v266_v3  ;;  %462 = vmatpush.msra.mxu1 %v266_v3 }
  0x31   : > { %450 = vmatmul.msk.f32.vlgmr.msra.gmra.mxu0 %vm274_vm0, %v264_v4  ;;  %451 = vmatmul.msk.f32.vlgmr.msra.gmra.mxu1 %vm274_vm0, %v265_v5  ;;  %p654_p6 = pnand %p653_p5, %p839_p13  ;;  %p659_p10 = por %p658_p9, %p657_p8 }
  0x33   : > { %p655_p7 = pneg %p654_p6 }
  0x35   : > { %p660_p11 = pnand %p659_p10, %p655_p7 }
  0xae   : > { %v298_v7 = vpop.f32.mrf.mxu0  ;;  %v301_v8 = vpop.f32.mrf.mxu1 }
  0xaf   : > { %v299_v9 = vadd.f32 %v545_v6, %v298_v7  ;;  %v302_v10 = vadd.f32 %v545_v6, %v301_v8 }
  0xb1   : > { %304 = vst.msk [vmem:[%s261_s29] sm:$0xff] %vm274_vm0, %v299_v9 }
  0xb2   : > { %305 = vst.msk [vmem:[%s261_s29 + $0x8] sm:$0xff] %vm274_vm0, %v302_v10 }
  0xb3   : > { %663 = shalt.err (!%p660_p11)
}
  0xb4   : > { %s727_s28 = smov 128   ;;  %s728_s7 = smov 8  }
  0xb5   : > { %471 = dma.vmem_to_hbm [thread:$0]  (%p839_p13), %s322_s4, 256, %s324_s5, %s307_s15, %s727_s28, %s727_s28, %s728_s7  }
  0xb6 PF: > { %p491_p12 = scmp.ge.s32.totalorder %s722_s17, 2  ;;  %s338_s9 = sand.u32 1, %s702_s12  }
  0xb7   : > { %s339_s10 = scalar_lea.sflag [#allocation4], %s338_s9 }
  0xb8   : > { %p485_p2 = pnand %p491_p12, %p843_p0 }
  0xba   : > { %p486_p3 = pneg %p485_p2 }
  0xbc   : > { %697 = dma.done.wait (%p486_p3), %s339_s10, 256  }
  0xbd   : > { %699 = vsyncadd (%p486_p3), %s339_s10, 4294967040  ;;  %s20_s17 = sadd.s32 1, %s722_s17   ;;  %s939_s12 = smov %s706_s13 }
  0xbe   : > { %p17_p1 = scmp.ge.s32.totalorder %s20_s17, 5   ;;  %s940_s13 = smov %s710_s14 }
  0xbf   : > { %s941_s14 = smov %s799_s24  ;;  %s942_s15 = smov %s718_s16 }
  0xc0   : > { %s943_s16 = smov %s945_s18  ;;  %19 = sbr.rel (!%p17_p1) target bundleno = 7 (0x7), region = 94 }
  0xc5   :  { %345 = vsyncpa [#allocation3], 1 }
  0xc6   :  { %347 = vsyncpa [#allocation3 + $0x1], 1 }
  0xc7   :  { %348 = vsyncpa [#allocation6], 1 }
  0xc8   :  { %350 = vsyncpa [#allocation6 + $0x1], 1 }
  0xc9   :  { %351 = vsyncpa [#allocation4], 1 }
  0xca   :  { %353 = vsyncpa [#allocation4 + $0x1], 1 }

</bundles_post_ra>
